<compile_context>
chip_gen: v5e
topology: v5e:2x2
jax: 0.10.0
libtpu: 0.0.40
codegen_flags: <defaults>
</compile_context>

<pallas_src>
import jax
import jax.numpy as jnp
from jax.experimental import pallas as pl
from jax.experimental.pallas import tpu as pltpu


def _round_up(x, m):
    return ((x + m - 1) // m) * m


def _sublane_multiple(dtype) -> int:
    """Native sublane packing for a dtype: f32 -> 8, bf16 -> 16, int8/fp8 -> 32."""
    itemsize = jnp.dtype(dtype).itemsize
    return max(8, 32 // max(1, itemsize))


def _chip_info():
    """Returns (is_v6_or_newer, has_two_tensorcores) for the first device."""
    try:
        kind = jax.devices()[0].device_kind.lower()
    except Exception:
        kind = ""
    is_v6_plus = any(tag in kind for tag in ("v6", "v7", "tpu7"))
    two_tc = ("v7" in kind) or ("tpu7" in kind)
    return is_v6_plus, two_tc


def _patch_expand_kernel(x_ref, w_ref, o_ref):
    # x_ref: (tm, Cp) tile of lane-packed pixels; w_ref: (Cp, Cp) block-diag W.T
    o_ref[...] = jnp.dot(
        x_ref[...], w_ref[...], preferred_element_type=jnp.float32
    ).astype(o_ref.dtype)


def patch_expand_forward(x, conv_weight, *, dim_scale=2, tm=None):
    """PatchExpand forward.

    Args:
      x: (B, H, W, C) channels-last input (matches the module's 'b h w c').
      conv_weight: (C_out=C, C_in=C) weight of the 1x1 conv (bias=False).
      dim_scale: only 2 applies the conv; otherwise Identity (returns x).
      tm: packed-row tile size override; default is chosen per TPU generation
          (8192 on v6e/v7x, 4096 on v5e / unknown).
    Returns:
      (B, H, W, C) output, same dtype as x.
    """
    if dim_scale != 2:
        # pixel_shuffle / adjust_channels are nn.Identity() in this branch.
        return x

    B, H, W, C = x.shape
    M = B * H * W
    dtype = x.dtype
    itemsize = jnp.dtype(dtype).itemsize
    sub = _sublane_multiple(dtype)

    # Lane packing: group `pack` consecutive pixels so the last dim is 128.
    if C < 128 and 128 % C == 0:
        pack = 128 // C
    else:
        # TODO(synk): C that does not divide 128 falls back to pack=1 (correct,
        # but lane-masked stores when C % 128 != 0).
        pack = 1
    Cp = pack * C

    # out = x @ W.T ; block-diagonal replica of W.T for the packed pixels.
    # Cast the weight to the activation dtype so bf16 activations stay on the
    # bf16 x bf16 -> f32 MXU path; accumulation is f32 via
    # preferred_element_type inside the kernel.
    w_t = conv_weight.T.astype(dtype)
    if pack > 1:
        w_big = jnp.kron(jnp.eye(pack, dtype=w_t.dtype), w_t)  # (Cp, Cp)
    else:
        w_big = w_t

    # Pad only to a multiple of `pack` (usually 0 rows).  The ragged final
    # grid block is handled by Pallas (partial writes masked), so there is no
    # full-array pad/slice pass over HBM.
    pad_rows = (-M) % pack
    x_flat = x.reshape(M, C)
    if pad_rows:
        x_flat = jnp.pad(x_flat, ((0, pad_rows), (0, 0)))
    m_packed = (M + pad_rows) // pack
    x_packed = x_flat.reshape(m_packed, Cp)

    # Per-generation tile size: v6e/v7x take 8192 packed rows per step
    # (~16 MiB double-buffered working set for f32); v5e stays at 4096 so the
    # working set (~8 MiB) fits its 16 MiB scoped-VMEM default.
    is_v6_plus, two_tc = _chip_info()
    if tm is None:
        tm = 8192 if is_v6_plus else 4096

    g = max(1, pl.cdiv(m_packed, tm))
    if two_tc:
        # Keep the single parallel axis even (and >= 2 when possible) so both
        # v7x TensorCores get the same number of grid steps.
        if g == 1 and m_packed > sub:
            g = 2
        elif g > 1 and g % 2 == 1:
            g += 1
    tm_eff = _round_up(pl.cdiv(m_packed, g), sub)
    if tm_eff >= m_packed:
        tm_eff = m_packed          # single block == full array dim (legal)
        grid_m = 1
    else:
        grid_m = pl.cdiv(m_packed, tm_eff)

    w_bytes = Cp * Cp * jnp.dtype(w_big.dtype).itemsize
    tile_bytes = tm_eff * Cp * itemsize
    # 2 double-buffered streams (in + out) + resident weight + headroom.
    vmem_limit = int(max(4 * tile_bytes + w_bytes + (8 << 20), 16 << 20))

    cost = pl.CostEstimate(
        flops=2 * m_packed * Cp * Cp,
        transcendentals=0,
        bytes_accessed=2 * m_packed * Cp * itemsize + w_bytes,
    )

    out_packed = pl.pallas_call(
        _patch_expand_kernel,
        out_shape=jax.ShapeDtypeStruct((m_packed, Cp), dtype),
        grid_spec=pltpu.PrefetchScalarGridSpec(
            num_scalar_prefetch=0,
            grid=(grid_m,),
            in_specs=[
                pl.BlockSpec((tm_eff, Cp), lambda i: (i, 0)),
                # Constant index_map -> the (Cp, Cp) weight tile stays resident
                # in VMEM across grid steps (no per-step re-fetch).
                pl.BlockSpec((Cp, Cp), lambda i: (0, 0)),
            ],
            out_specs=pl.BlockSpec((tm_eff, Cp), lambda i: (i, 0)),
        ),
        compiler_params=pltpu.CompilerParams(
            dimension_semantics=("parallel",),
            vmem_limit_bytes=vmem_limit,
        ),
        cost_estimate=cost,
    )(x_packed, w_big)

    out_flat = out_packed.reshape(m_packed * pack, C)
    if pad_rows:
        out_flat = out_flat[:M]
    return out_flat.reshape(B, H, W, C)


if __name__ == "__main__":
    # Shapes consistent with the module: dim (=C) = 32, B=2, H=W=16.
    B, H, W, C = 2, 16, 16, 32
    key = jax.random.PRNGKey(0)
    kx, kw = jax.random.split(key)

    x = jax.random.normal(kx, (B, H, W, C), dtype=jnp.float32)
    # Conv2d(dim, dim, kernel_size=1, bias=False) weight (out, in, 1, 1)
    # squeezed to (out, in); deterministic synthetic init.
    bound = 1.0 / (C ** 0.5)
    conv_weight = jax.random.uniform(
        kw, (C, C), minval=-bound, maxval=bound, dtype=jnp.float32
    )

    out = patch_expand_forward(x, conv_weight)
    out = jax.block_until_ready(out)

    # Pure-JAX reference (1x1 conv == per-pixel matmul).
    ref = jnp.einsum("bhwc,oc->bhwo", x, conv_weight)
    assert out.shape == (B, H, W, C)
    assert jnp.allclose(out, ref, atol=1e-5, rtol=1e-5)

    # Ragged-tail path (B*H*W not a multiple of the packed tile / pack).
    x2 = jax.random.normal(kx, (1, 5, 7, C), dtype=jnp.float32)
    out2 = jax.block_until_ready(patch_expand_forward(x2, conv_weight))
    ref2 = jnp.einsum("bhwc,oc->bhwo", x2, conv_weight)
    assert jnp.allclose(out2, ref2, atol=1e-5, rtol=1e-5)

    # bf16 path (checks dtype-aware sublane rounding + bf16 weight cast).
    x3 = x.astype(jnp.bfloat16)
    out3 = jax.block_until_ready(patch_expand_forward(x3, conv_weight))
    ref3 = jnp.einsum(
        "bhwc,oc->bhwo", x3.astype(jnp.float32),
        conv_weight.astype(jnp.bfloat16).astype(jnp.float32),
    ).astype(jnp.bfloat16)
    assert out3.dtype == jnp.bfloat16
    assert jnp.allclose(
        out3.astype(jnp.float32), ref3.astype(jnp.float32), atol=2e-2, rtol=2e-2
    )

    print("KERNEL_OK")
</pallas_src>

<mosaic_0001>
module attributes {stable_mosaic.version = 11 : i64} {
  func.func @_patch_expand_kernel(%arg0: i32, %arg1: memref<128x128xf32, #tpu.memory_space<vmem>>, %arg2: memref<128x128xf32, #tpu.memory_space<vmem>>, %arg3: memref<128x128xf32, #tpu.memory_space<vmem>>) attributes {dimension_semantics = [#tpu.dimension_semantics<parallel>], iteration_bounds = array<i64: 1>, scalar_prefetch = 0 : i64, scratch_operands = 0 : i64, tpu.core_type = #tpu.core_type<tc>, window_params = [{transform_indices = @transform_0, window_bounds = array<i64: 128, 128>}, {pipeline_mode = #tpu.pipeline_mode<synchronous>, transform_indices = @transform_1, window_bounds = array<i64: 128, 128>}, {transform_indices = @transform_2, window_bounds = array<i64: 128, 128>}]} {
    %c0 = arith.constant 0 : index
    %c0_0 = arith.constant 0 : index
    %0 = vector.load %arg1[%c0, %c0_0] : memref<128x128xf32, #tpu.memory_space<vmem>>, vector<128x128xf32>
    %c0_1 = arith.constant 0 : index
    %c0_2 = arith.constant 0 : index
    %1 = vector.load %arg2[%c0_1, %c0_2] : memref<128x128xf32, #tpu.memory_space<vmem>>, vector<128x128xf32>
    %cst = arith.constant dense<0.000000e+00> : vector<128x128xf32>
    %2 = tpu.matmul %0, %1, %cst {dimension_numbers = #tpu.dot_dimension_numbers<[1], [0], [0], [1], [0, 0, 1, 1], [], []>} : vector<128x128xf32>, vector<128x128xf32>, vector<128x128xf32> -> vector<128x128xf32>
    %c0_3 = arith.constant 0 : index
    %c0_4 = arith.constant 0 : index
    %3 = vector.load %arg3[%c0_3, %c0_4] : memref<128x128xf32, #tpu.memory_space<vmem>>, vector<128x128xf32>
    tpu.vector_store %arg3[%c0_3, %c0_4], %2 {strides = array<i32>} : memref<128x128xf32, #tpu.memory_space<vmem>>, vector<128x128xf32>,
    return
  }
  func.func @transform_0(%arg0: i32) -> (i32, i32) {
    %c0_i32 = arith.constant 0 : i32
    %c0_i32_0 = arith.constant 0 : i32
    return %arg0, %c0_i32 : i32, i32
  }
  func.func @transform_1(%arg0: i32) -> (i32, i32) {
    %c0_i32 = arith.constant 0 : i32
    %c0_i32_0 = arith.constant 0 : i32
    %c0_i32_1 = arith.constant 0 : i32
    return %c0_i32, %c0_i32_0 : i32, i32
  }
  func.func @transform_2(%arg0: i32) -> (i32, i32) {
    %c0_i32 = arith.constant 0 : i32
    %c0_i32_0 = arith.constant 0 : i32
    return %arg0, %c0_i32 : i32, i32
  }
}

</mosaic_0001>

<bundles_post_ra>
// kernel: tpu_custom_call.1
= control target key start
LH: loop header
LB: loop body
LE: loop exit
PB: predicated region body
PF: predicated region fallthrough
CT: control target
= control target key end

     0   :  { %7 = vsyncpa [#allocation3], 0  ;;  %s346_s0 = inlined_call_operand.hbm [shape: f32[128,128], index: 0, kind: input, shape index: {}]   ;;  %s347_s1 = inlined_call_operand.hbm [shape: f32[128,128], index: 1, kind: input, shape index: {}]   ;;  %s348_s2 = inlined_call_operand.hbm [shape: f32[128,128], index: 2, kind: output, shape index: {}]  }
   0x1   :  { %8 = vsyncpa [#allocation6], 0 }
   0x2   :  { %9 = vsyncpa [#allocation4], 0  ;;  %s14_s11 = sshll.u32 %s346_s0, 4  ;;  %s308_s12 = smov [#allocation2]   ;;  %s15_s11 = int_to_ptr.hbm [resolvable:$true] %s14_s11 }
   0x3   :  { %s16_s13 = sshll.u32 %s308_s12, 4  ;;  %s27_s16 = sshll.u32 %s347_s1, 4  ;;  %s17_s13 = int_to_ptr.vmem [resolvable:$true] %s16_s13  ;;  %s28_s16 = int_to_ptr.hbm [resolvable:$true] %s27_s16 }
   0x4   :  { %s309_s17 = smov 128   ;;  %s310_s18 = smov 8  }
   0x5   :  { %22 = dma.hbm_to_vmem [thread:$0]  %s15_s11, 2048, %s17_s13, [#allocation3], %s309_s17, %s309_s17, %s310_s18  }
   0x6   :  { %s311_s19 = smov [#allocation5]  }
   0x7   :  { %s29_s20 = sshll.u32 %s311_s19, 4  ;;  %s30_s20 = int_to_ptr.vmem [resolvable:$true] %s29_s20 }
   0x8   :  { %35 = dma.hbm_to_vmem [thread:$0]  %s28_s16, 2048, %s30_s20, [#allocation6], %s309_s17, %s309_s17, %s310_s18  }
   0x9   :  { %302 = dma.done.wait [#allocation3], 2048  }
   0xa   :  { %303 = vsyncadd [#allocation3], 4294965248 }
   0xb   :  { %304 = dma.done.wait [#allocation6], 2048  }
   0xc   :  { %305 = vsyncadd [#allocation6], 4294965248  ;;  %v75_v0 = vld [vmem:[#allocation5 + $0x78] sm:$0xff]  ;;  %v74_v1 = vld [vmem:[#allocation5 + $0x70] sm:$0xff]  ;;  %s312_s0 = smov [#allocation7]   ;;  %s163_s23 = sshll.u32 %s348_s2, 4  ;;  %s164_s23 = int_to_ptr.hbm [resolvable:$true] %s163_s23 }
   0xd   :  { %178 = vmatpush.msra.mxu2 %v75_v0  ;;  %179 = vmatpush.msra.mxu3 %v75_v0  ;;  %v73_v2 = vld [vmem:[#allocation5 + $0x68] sm:$0xff]  ;;  %v72_v3 = vld [vmem:[#allocation5 + $0x60] sm:$0xff]  ;;  %v71_v4 = vld [vmem:[#allocation5 + $0x58] sm:$0xff]  ;;  %s161_s1 = sshll.u32 %s312_s0, 4  ;;  %s162_s1 = int_to_ptr.vmem [resolvable:$true] %s161_s1 }
   0xe   :  { %76 = vmatpush.msra.mxu0 %v75_v0  ;;  %177 = vmatpush.msra.mxu1 %v75_v0  ;;  %v70_v5 = vld [vmem:[#allocation5 + $0x50] sm:$0xff]  ;;  %v69_v6 = vld [vmem:[#allocation5 + $0x48] sm:$0xff]  ;;  %v68_v7 = vld [vmem:[#allocation5 + $0x40] sm:$0xff] }
   0xf   :  { %181 = vmatpush.msra.mxu2 %v74_v1  ;;  %182 = vmatpush.msra.mxu3 %v74_v1  ;;  %v67_v8 = vld [vmem:[#allocation5 + $0x38] sm:$0xff]  ;;  %v66_v9 = vld [vmem:[#allocation5 + $0x30] sm:$0xff]  ;;  %v65_v10 = vld [vmem:[#allocation5 + $0x28] sm:$0xff] }
  0x10   :  { %77 = vmatpush.msra.mxu0 %v74_v1  ;;  %180 = vmatpush.msra.mxu1 %v74_v1  ;;  %v64_v11 = vld [vmem:[#allocation5 + $0x20] sm:$0xff]  ;;  %v63_v12 = vld [vmem:[#allocation5 + $0x18] sm:$0xff]  ;;  %v62_v13 = vld [vmem:[#allocation5 + $0x10] sm:$0xff] }
  0x11   :  { %184 = vmatpush.msra.mxu2 %v73_v2  ;;  %185 = vmatpush.msra.mxu3 %v73_v2  ;;  %v61_v14 = vld [vmem:[#allocation5 + $0x8] sm:$0xff]  ;;  %v60_v15 = vld [vmem:[#allocation5] sm:$0xff]  ;;  %v54_v24 = vld [vmem:[#allocation2 + $0x50] sm:$0xff] }
  0x12   :  { %78 = vmatpush.msra.mxu0 %v73_v2  ;;  %183 = vmatpush.msra.mxu1 %v73_v2  ;;  %v52_v16 = vld [vmem:[#allocation2 + $0x40] sm:$0xff]  ;;  %v53_v20 = vld [vmem:[#allocation2 + $0x48] sm:$0xff]  ;;  %v58_v25 = vld [vmem:[#allocation2 + $0x70] sm:$0xff] }
  0x13   :  { %187 = vmatpush.msra.mxu2 %v72_v3  ;;  %188 = vmatpush.msra.mxu3 %v72_v3  ;;  %v56_v17 = vld [vmem:[#allocation2 + $0x60] sm:$0xff]  ;;  %v57_v21 = vld [vmem:[#allocation2 + $0x68] sm:$0xff]  ;;  %v46_v26 = vld [vmem:[#allocation2 + $0x10] sm:$0xff] }
  0x14   :  { %79 = vmatpush.msra.mxu0 %v72_v3  ;;  %186 = vmatpush.msra.mxu1 %v72_v3  ;;  %v44_v18 = vld [vmem:[#allocation2] sm:$0xff]  ;;  %v45_v22 = vld [vmem:[#allocation2 + $0x8] sm:$0xff]  ;;  %v50_v27 = vld [vmem:[#allocation2 + $0x30] sm:$0xff] }
  0x15   :  { %190 = vmatpush.msra.mxu2 %v71_v4  ;;  %191 = vmatpush.msra.mxu3 %v71_v4  ;;  %v48_v19 = vld [vmem:[#allocation2 + $0x20] sm:$0xff]  ;;  %v49_v23 = vld [vmem:[#allocation2 + $0x28] sm:$0xff]  ;;  %v55_v28 = vld [vmem:[#allocation2 + $0x58] sm:$0xff] }
  0x16   :  { %80 = vmatpush.msra.mxu0 %v71_v4  ;;  %189 = vmatpush.msra.mxu1 %v71_v4  ;;  %v59_v29 = vld [vmem:[#allocation2 + $0x78] sm:$0xff] }
  0x17   :  { %193 = vmatpush.msra.mxu2 %v70_v5  ;;  %194 = vmatpush.msra.mxu3 %v70_v5  ;;  %v47_v30 = vld [vmem:[#allocation2 + $0x18] sm:$0xff] }
  0x18   :  { %81 = vmatpush.msra.mxu0 %v70_v5  ;;  %192 = vmatpush.msra.mxu1 %v70_v5  ;;  %v51_v31 = vld [vmem:[#allocation2 + $0x38] sm:$0xff] }
  0x19   :  { %196 = vmatpush.msra.mxu2 %v69_v6  ;;  %197 = vmatpush.msra.mxu3 %v69_v6 }
  0x1a   :  { %82 = vmatpush.msra.mxu0 %v69_v6  ;;  %195 = vmatpush.msra.mxu1 %v69_v6 }
  0x1b   :  { %199 = vmatpush.msra.mxu2 %v68_v7  ;;  %200 = vmatpush.msra.mxu3 %v68_v7 }
  0x1c   :  { %83 = vmatpush.msra.mxu0 %v68_v7  ;;  %198 = vmatpush.msra.mxu1 %v68_v7 }
  0x1d   :  { %202 = vmatpush.msra.mxu2 %v67_v8  ;;  %203 = vmatpush.msra.mxu3 %v67_v8 }
  0x1e   :  { %84 = vmatpush.msra.mxu0 %v67_v8  ;;  %201 = vmatpush.msra.mxu1 %v67_v8 }
  0x1f   :  { %205 = vmatpush.msra.mxu2 %v66_v9  ;;  %206 = vmatpush.msra.mxu3 %v66_v9 }
  0x20   :  { %85 = vmatpush.msra.mxu0 %v66_v9  ;;  %204 = vmatpush.msra.mxu1 %v66_v9 }
  0x21   :  { %208 = vmatpush.msra.mxu2 %v65_v10  ;;  %209 = vmatpush.msra.mxu3 %v65_v10 }
  0x22   :  { %86 = vmatpush.msra.mxu0 %v65_v10  ;;  %207 = vmatpush.msra.mxu1 %v65_v10 }
  0x23   :  { %211 = vmatpush.msra.mxu2 %v64_v11  ;;  %212 = vmatpush.msra.mxu3 %v64_v11 }
  0x24   :  { %87 = vmatpush.msra.mxu0 %v64_v11  ;;  %210 = vmatpush.msra.mxu1 %v64_v11 }
  0x25   :  { %214 = vmatpush.msra.mxu2 %v63_v12  ;;  %215 = vmatpush.msra.mxu3 %v63_v12 }
  0x26   :  { %88 = vmatpush.msra.mxu0 %v63_v12  ;;  %213 = vmatpush.msra.mxu1 %v63_v12 }
  0x27   :  { %217 = vmatpush.msra.mxu2 %v62_v13  ;;  %218 = vmatpush.msra.mxu3 %v62_v13 }
  0x28   :  { %89 = vmatpush.msra.mxu0 %v62_v13  ;;  %216 = vmatpush.msra.mxu1 %v62_v13 }
  0x29   :  { %220 = vmatpush.msra.mxu2 %v61_v14  ;;  %221 = vmatpush.msra.mxu3 %v61_v14 }
  0x2a   :  { %90 = vmatpush.msra.mxu0 %v61_v14  ;;  %219 = vmatpush.msra.mxu1 %v61_v14 }
  0x2b   :  { %223 = vmatpush.msra.mxu2 %v60_v15  ;;  %224 = vmatpush.msra.mxu3 %v60_v15 }
  0x2c   :  { %116 = vmatmul.f32.vlgmr.msra.gmra.mxu2 %v52_v16  ;;  %128 = vmatmul.f32.vlgmr.msra.gmra.mxu3 %v56_v17 }
  0x2d   :  { %91 = vmatpush.msra.mxu0 %v60_v15  ;;  %222 = vmatpush.msra.mxu1 %v60_v15 }
  0x2e   :  { %92 = vmatmul.f32.vlgmr.msra.gmra.mxu0 %v44_v18  ;;  %104 = vmatmul.f32.vlgmr.msra.gmra.mxu1 %v48_v19 }
  0x34   :  { %119 = vmatmul.f32.gmra.mxu2 %v53_v20  ;;  %131 = vmatmul.f32.gmra.mxu3 %v57_v21 }
  0x36   :  { %95 = vmatmul.f32.gmra.mxu0 %v45_v22  ;;  %107 = vmatmul.f32.gmra.mxu1 %v49_v23 }
  0x3c   :  { %122 = vmatmul.f32.gmra.mxu2 %v54_v24  ;;  %134 = vmatmul.f32.gmra.mxu3 %v58_v25 }
  0x3e   :  { %98 = vmatmul.f32.gmra.mxu0 %v46_v26  ;;  %110 = vmatmul.f32.gmra.mxu1 %v50_v27 }
  0x44   :  { %125 = vmatmul.f32.gmra.mxu2 %v55_v28  ;;  %137 = vmatmul.f32.gmra.mxu3 %v59_v29 }
  0x46   :  { %101 = vmatmul.f32.gmra.mxu0 %v47_v30  ;;  %113 = vmatmul.f32.gmra.mxu1 %v51_v31 }
  0xab   :  { %v93_v32 = vpop.f32.mrf.mxu0  ;;  %v105_v33 = vpop.f32.mrf.mxu1 }
  0xac   :  { %141 = vst [vmem:[#allocation7] sm:$0xff] %v93_v32 }
  0xad   :  { %145 = vst [vmem:[#allocation7 + $0x20] sm:$0xff] %v105_v33 }
  0xaf   :  { %v117_v34 = vpop.f32.mrf.mxu2  ;;  %v129_v35 = vpop.f32.mrf.mxu3 }
  0xb0   :  { %149 = vst [vmem:[#allocation7 + $0x40] sm:$0xff] %v117_v34 }
  0xb1   :  { %153 = vst [vmem:[#allocation7 + $0x60] sm:$0xff] %v129_v35 }
  0xb3   :  { %v96_v36 = vpop.f32.mrf.mxu0  ;;  %v108_v37 = vpop.f32.mrf.mxu1 }
  0xb4   :  { %142 = vst [vmem:[#allocation7 + $0x8] sm:$0xff] %v96_v36 }
  0xb5   :  { %146 = vst [vmem:[#allocation7 + $0x28] sm:$0xff] %v108_v37 }
  0xb7   :  { %v120_v38 = vpop.f32.mrf.mxu2  ;;  %v132_v39 = vpop.f32.mrf.mxu3 }
  0xb8   :  { %150 = vst [vmem:[#allocation7 + $0x48] sm:$0xff] %v120_v38 }
  0xb9   :  { %154 = vst [vmem:[#allocation7 + $0x68] sm:$0xff] %v132_v39 }
  0xbb   :  { %v99_v40 = vpop.f32.mrf.mxu0  ;;  %v111_v41 = vpop.f32.mrf.mxu1 }
  0xbc   :  { %143 = vst [vmem:[#allocation7 + $0x10] sm:$0xff] %v99_v40 }
  0xbd   :  { %147 = vst [vmem:[#allocation7 + $0x30] sm:$0xff] %v111_v41 }
  0xbf   :  { %v123_v42 = vpop.f32.mrf.mxu2  ;;  %v135_v43 = vpop.f32.mrf.mxu3 }
  0xc0   :  { %151 = vst [vmem:[#allocation7 + $0x50] sm:$0xff] %v123_v42 }
  0xc1   :  { %155 = vst [vmem:[#allocation7 + $0x70] sm:$0xff] %v135_v43 }
  0xc3   :  { %v102_v44 = vpop.f32.mrf.mxu0  ;;  %v114_v45 = vpop.f32.mrf.mxu1 }
  0xc4   :  { %144 = vst [vmem:[#allocation7 + $0x18] sm:$0xff] %v102_v44 }
  0xc5   :  { %148 = vst [vmem:[#allocation7 + $0x38] sm:$0xff] %v114_v45 }
  0xc7   :  { %v126_v46 = vpop.f32.mrf.mxu2  ;;  %v138_v47 = vpop.f32.mrf.mxu3 }
  0xc8   :  { %152 = vst [vmem:[#allocation7 + $0x58] sm:$0xff] %v126_v46 }
  0xc9   :  { %156 = vst [vmem:[#allocation7 + $0x78] sm:$0xff] %v138_v47 }
  0xca   :  { %169 = dma.vmem_to_hbm [thread:$0]  %s162_s1, 2048, %s164_s23, [#allocation4], %s309_s17, %s309_s17, %s310_s18  }
  0xcb   :  { %306 = dma.done.wait [#allocation4], 2048  }
  0xcc   :  { %307 = vsyncadd [#allocation4], 4294965248 }
  0xcd   :  { %174 = vsyncpa [#allocation3], 1 }
  0xce   :  { %175 = vsyncpa [#allocation6], 1 }
  0xcf   :  { %176 = vsyncpa [#allocation4], 1 }

</bundles_post_ra>
